<compile_context>
chip_gen: v7x
topology: tpu7x:2x2x1
jax: 0.10.0
libtpu: 0.0.40
codegen_flags: <defaults>
</compile_context>

<pallas_src>
import functools
import math

import jax
import jax.numpy as jnp
import numpy as np
from jax.experimental import pallas as pl
from jax.experimental.pallas import tpu as pltpu

IGNORE_INDEX = 255


def _ce_kernel(logits_ref, target_ref, cw_ref, *rest, n_s, has_w):
    """Weighted cross entropy over one (C, TILE_S) slab of one batch element.

    logits_ref : (C, TILE_S) float    — classes on sublanes, spatial on lanes
    target_ref : (1, TILE_S) int32    — class indices (255 = ignore)
    cw_ref     : (C, 1)      float32  — per-class weights
    w_ref      : (1, TILE_S) float32  — optional per-element weights (has_w)
    out_ref    : (1, 1)      float32  — per-batch running sum (resident over s)
    """
    if has_w:
        w_ref, out_ref = rest
    else:
        (out_ref,) = rest
        w_ref = None

    s_idx = pl.program_id(1)

    @pl.when(s_idx == 0)
    def _():
        out_ref[...] = jnp.zeros_like(out_ref)

    x = logits_ref[...].astype(jnp.float32)          # (C, TS)
    t = target_ref[...]                              # (1, TS) int32
    cw = cw_ref[...].astype(jnp.float32)             # (C, 1)
    tile_s = x.shape[-1]

    # numerically-stable logsumexp over classes (sublane axis)
    m = jnp.max(x, axis=0, keepdims=True)                                  # (1, TS)
    lse = m + jnp.log(jnp.sum(jnp.exp(x - m), axis=0, keepdims=True))      # (1, TS)

    # pick target logit and its class weight with a single masked reduce each.
    # NOTE: if C > 255, class 255 aliases IGNORE_INDEX in this compare; the
    # `valid` mask below still zeroes those elements, matching PyTorch.
    cls = jax.lax.broadcasted_iota(jnp.int32, x.shape, 0)                  # (C, TS)
    onehot = cls == t                                                      # (C, TS) bool
    picked = jnp.sum(jnp.where(onehot, x, 0.0), axis=0, keepdims=True)     # (1, TS)
    cw_t = jnp.sum(jnp.where(onehot, cw, 0.0), axis=0, keepdims=True)      # (1, TS)

    loss = (lse - picked) * cw_t
    loss = jnp.where(t != IGNORE_INDEX, loss, 0.0)
    if has_w:
        loss = loss * w_ref[...].astype(jnp.float32)

    # mask the ragged tail of the last spatial tile (no padding copies in HBM;
    # out-of-bounds lanes may contain garbage -> select, never multiply).
    lanes = jax.lax.broadcasted_iota(jnp.int32, (1, tile_s), 1)
    loss = jnp.where(lanes + s_idx * tile_s < n_s, loss, 0.0)

    out_ref[...] = out_ref[...] + jnp.sum(loss)


def _pick_tile_s(S, C, has_w, budget_bytes=16 << 20):
    """Pick the spatial tile so double-buffered, sublane-padded input blocks
    fit in ~budget_bytes of VMEM (works on v5e/v6e 128 MiB and v7x 64 MiB)."""
    if S <= 128:
        return int(S)                       # single block == full dim
    c_pad = ((C + 7) // 8) * 8              # logits sublanes pad to 8
    # bytes per lane: double-buffered f32/int32 blocks, (1,*) rows pad to 8 sublanes
    per_lane = 2 * 4 * (c_pad + 8 + (8 if has_w else 0))
    tile = budget_bytes // per_lane
    tile = min(int(tile), int(S))
    tile = max((tile // 128) * 128, 128)
    return int(tile)


def cross_entropy_loss(logits, target, class_weight=None, w=None):
    """JAX/Pallas equivalent of CrossEntropyLoss(weight=class_weight).forward.

    logits : (B, C, N1, N2, ...)   float
    target : (B, N1, N2, ...)      int  (255 = ignore)
    w      : optional per-element weights, same shape as target
    returns scalar float32 loss
    """
    B, C = int(logits.shape[0]), int(logits.shape[1])
    spatial = logits.shape[2:]
    S = int(math.prod(spatial)) if spatial else 1
    n_elems = B * S

    # Free reshapes only (merge trailing dims of contiguous NCHW) — no copies.
    x3 = logits.reshape(B, C, S)
    t3 = target.reshape(B, 1, S).astype(jnp.int32)

    if class_weight is None:
        cw2 = jnp.ones((C, 1), dtype=jnp.float32)
    else:
        cw2 = jnp.asarray(class_weight, dtype=jnp.float32).reshape(C, 1)

    has_w = w is not None
    if has_w:
        w3 = jnp.asarray(w, dtype=jnp.float32).reshape(B, 1, S)

    tile_s = _pick_tile_s(S, C, has_w)
    grid_s = pl.cdiv(S, tile_s)
    grid = (B, grid_s)

    in_specs = [
        pl.BlockSpec((None, C, tile_s), lambda b, s: (b, 0, s)),   # logits slab
        pl.BlockSpec((None, 1, tile_s), lambda b, s: (b, 0, s)),   # targets row
        pl.BlockSpec((C, 1), lambda b, s: (0, 0)),                 # class weights
    ]
    args = [x3, t3, cw2]
    if has_w:
        in_specs.append(pl.BlockSpec((None, 1, tile_s), lambda b, s: (b, 0, s)))
        args.append(w3)

    out_specs = pl.BlockSpec((None, 1, 1), lambda b, s: (b, 0, 0))  # per-b partial

    itemsize = jnp.dtype(logits.dtype).itemsize
    cost = pl.CostEstimate(
        flops=int(5 * n_elems * C),
        transcendentals=int(n_elems * (C + 1)),
        bytes_accessed=int(n_elems * C * itemsize
                           + n_elems * 4 * (2 if has_w else 1) + B * 4),
    )

    kernel = functools.partial(_ce_kernel, n_s=S, has_w=has_w)

    partials = pl.pallas_call(
        kernel,
        out_shape=jax.ShapeDtypeStruct((B, 1, 1), jnp.float32),
        grid_spec=pltpu.PrefetchScalarGridSpec(
            num_scalar_prefetch=0,
            grid=grid,
            in_specs=in_specs,
            out_specs=out_specs,
        ),
        compiler_params=pltpu.CompilerParams(
            dimension_semantics=("parallel", "arbitrary"),
            vmem_limit_bytes=32 << 20,
        ),
        cost_estimate=cost,
    )(*args)

    # .mean() over all (B, N1, N2, ...) elements (ignored ones contribute 0)
    return jnp.sum(partials) / jnp.float32(n_elems)


def _reference(logits, target, class_weight=None, w=None):
    """Pure-JAX reference matching torch.nn.CrossEntropyLoss semantics."""
    B, C = logits.shape[0], logits.shape[1]
    perm = (0,) + tuple(range(2, logits.ndim)) + (1,)
    x = jnp.transpose(logits, perm).reshape(-1, C).astype(jnp.float32)
    t = target.reshape(-1).astype(jnp.int32)
    logp = jax.nn.log_softmax(x, axis=-1)
    valid = (t != IGNORE_INDEX)
    t_safe = jnp.where(valid, t, 0)
    nll = -jnp.take_along_axis(logp, t_safe[:, None], axis=1)[:, 0]
    if class_weight is not None:
        cw = jnp.asarray(class_weight, jnp.float32)
        nll = nll * cw[t_safe]
    nll = jnp.where(valid, nll, 0.0)
    if w is not None:
        nll = nll * jnp.asarray(w, jnp.float32).reshape(-1)
    return jnp.mean(nll)


if __name__ == "__main__":
    key = jax.random.PRNGKey(0)
    k1, k2, k3 = jax.random.split(key, 3)

    B, C, H, W = 2, 4, 16, 16
    logits = jax.random.normal(k1, (B, C, H, W), dtype=jnp.float32)
    target = jax.random.randint(k2, (B, H, W), 0, C, dtype=jnp.int32)
    # mark a few pixels as ignore_index
    target = target.at[0, 0, :4].set(IGNORE_INDEX)

    # deterministic class weights (module's optional `weight` arg, shape (C,))
    class_weight = jnp.array([0.5, 1.0, 1.5, 2.0], dtype=jnp.float32)
    # optional per-element weights `w`
    w_elem = jax.random.uniform(k3, (B, H, W), dtype=jnp.float32)

    # case 1: w=None (no per-element weight input is materialized or DMA'd)
    out1 = cross_entropy_loss(logits, target, class_weight=class_weight, w=None)
    jax.block_until_ready(out1)
    ref1 = _reference(logits, target, class_weight=class_weight, w=None)
    np.testing.assert_allclose(np.asarray(out1), np.asarray(ref1),
                               rtol=1e-5, atol=1e-5)

    # case 2: with per-element weights
    out2 = cross_entropy_loss(logits, target, class_weight=class_weight, w=w_elem)
    jax.block_until_ready(out2)
    ref2 = _reference(logits, target, class_weight=class_weight, w=w_elem)
    np.testing.assert_allclose(np.asarray(out2), np.asarray(ref2),
                               rtol=1e-5, atol=1e-5)

    # case 3: no class weights, no per-element weights
    out3 = cross_entropy_loss(logits, target)
    jax.block_until_ready(out3)
    ref3 = _reference(logits, target)
    np.testing.assert_allclose(np.asarray(out3), np.asarray(ref3),
                               rtol=1e-5, atol=1e-5)

    print("KERNEL_OK")
</pallas_src>

<mosaic_0001>
module attributes {stable_mosaic.version = 11 : i64} {
  func.func @_ce_kernel(%arg0: i32, %arg1: i32, %arg2: memref<1x4x256xf32, #tpu.memory_space<vmem>>, %arg3: memref<1x1x256xi32, #tpu.memory_space<vmem>>, %arg4: memref<4x1xf32, #tpu.memory_space<vmem>>, %arg5: memref<1x1x1xf32, #tpu.memory_space<vmem>>) attributes {dimension_semantics = [#tpu.dimension_semantics<parallel>, #tpu.dimension_semantics<arbitrary>], iteration_bounds = array<i64: 2, 1>, scalar_prefetch = 0 : i64, scratch_operands = 0 : i64, tpu.core_type = #tpu.core_type<tc>, window_params = [{transform_indices = @transform_0, window_bounds = array<i64: 1, 4, 256>}, {transform_indices = @transform_1, window_bounds = array<i64: 1, 1, 256>}, {pipeline_mode = #tpu.pipeline_mode<synchronous>, transform_indices = @transform_2, window_bounds = array<i64: 4, 1>}, {transform_indices = @transform_3, window_bounds = array<i64: 1, 1, 1>}]} {
    %c0_i32 = arith.constant 0 : i32
    %0 = arith.cmpi eq, %arg1, %c0_i32 : i32
    %1 = arith.extui %0 : i1 to i32
    %c0_i32_0 = arith.constant 0 : i32
    %2 = arith.cmpi ne, %1, %c0_i32_0 : i32
    scf.if %2 {
      %cst_23 = arith.constant 0.000000e+00 : f32
      %55 = vector.broadcast %cst_23 : f32 to vector<1x1xf32>
      %c0_24 = arith.constant 0 : index
      %c0_25 = arith.constant 0 : index
      %c0_26 = arith.constant 0 : index
      %56 = vector.load %arg5[%c0_24, %c0_25, %c0_26] : memref<1x1x1xf32, #tpu.memory_space<vmem>>, vector<1x1x1xf32>
      %57 = vector.shape_cast %56 : vector<1x1x1xf32> to vector<1x1xf32>
      %58 = vector.shape_cast %55 : vector<1x1xf32> to vector<1x1x1xf32>
      tpu.vector_store %arg5[%c0_24, %c0_25, %c0_26], %58 {strides = array<i32>} : memref<1x1x1xf32, #tpu.memory_space<vmem>>, vector<1x1x1xf32>,
    } else {
    }
    %c0 = arith.constant 0 : index
    %c0_1 = arith.constant 0 : index
    %c0_2 = arith.constant 0 : index
    %3 = vector.load %arg2[%c0, %c0_1, %c0_2] : memref<1x4x256xf32, #tpu.memory_space<vmem>>, vector<1x4x256xf32>
    %4 = vector.shape_cast %3 : vector<1x4x256xf32> to vector<4x256xf32>
    %c0_3 = arith.constant 0 : index
    %c0_4 = arith.constant 0 : index
    %c0_5 = arith.constant 0 : index
    %5 = vector.load %arg3[%c0_3, %c0_4, %c0_5] : memref<1x1x256xi32, #tpu.memory_space<vmem>>, vector<1x1x256xi32>
    %6 = vector.shape_cast %5 : vector<1x1x256xi32> to vector<1x256xi32>
    %c0_6 = arith.constant 0 : index
    %c0_7 = arith.constant 0 : index
    %7 = vector.load %arg4[%c0_6, %c0_7] : memref<4x1xf32, #tpu.memory_space<vmem>>, vector<4x1xf32>
    %cst = arith.constant dense<0xFF800000> : vector<256xf32>
    %8 = vector.multi_reduction <maximumf>, %4, %cst [0] : vector<4x256xf32> to vector<256xf32>
    %9 = vector.shape_cast %8 : vector<256xf32> to vector<1x256xf32>
    %10 = vector.broadcast %9 : vector<1x256xf32> to vector<4x256xf32>
    %11 = arith.subf %4, %10 : vector<4x256xf32>
    %12 = math.exp %11 : vector<4x256xf32>
    %cst_8 = arith.constant dense<0.000000e+00> : vector<256xf32>
    %13 = vector.multi_reduction <add>, %12, %cst_8 [0] : vector<4x256xf32> to vector<256xf32>
    %14 = vector.shape_cast %13 : vector<256xf32> to vector<1x256xf32>
    %15 = math.log %14 : vector<1x256xf32>
    %16 = arith.addf %9, %15 : vector<1x256xf32>
    %17 = tpu.iota {dimensions = array<i32: 0>} : vector<4x256xi32>
    %18 = vector.broadcast %6 : vector<1x256xi32> to vector<4x256xi32>
    %19 = arith.cmpi eq, %17, %18 : vector<4x256xi32>
    %cst_9 = arith.constant 0.000000e+00 : f32
    %20 = vector.broadcast %cst_9 : f32 to vector<4x256xf32>
    %21 = arith.select %19, %4, %20 : vector<4x256xi1>, vector<4x256xf32>
    %cst_10 = arith.constant dense<0.000000e+00> : vector<256xf32>
    %22 = vector.multi_reduction <add>, %21, %cst_10 [0] : vector<4x256xf32> to vector<256xf32>
    %23 = vector.shape_cast %22 : vector<256xf32> to vector<1x256xf32>
    %cst_11 = arith.constant 0.000000e+00 : f32
    %24 = vector.shape_cast %7 : vector<4x1xf32> to vector<4x1xf32>
    %25 = vector.broadcast %24 : vector<4x1xf32> to vector<4x256xf32>
    %26 = vector.broadcast %cst_11 : f32 to vector<4x256xf32>
    %27 = arith.select %19, %25, %26 : vector<4x256xi1>, vector<4x256xf32>
    %cst_12 = arith.constant dense<0.000000e+00> : vector<256xf32>
    %28 = vector.multi_reduction <add>, %27, %cst_12 [0] : vector<4x256xf32> to vector<256xf32>
    %29 = vector.shape_cast %28 : vector<256xf32> to vector<1x256xf32>
    %30 = arith.subf %16, %23 : vector<1x256xf32>
    %31 = arith.mulf %30, %29 : vector<1x256xf32>
    %c255_i32 = arith.constant 255 : i32
    %32 = vector.broadcast %c255_i32 : i32 to vector<1x256xi32>
    %33 = arith.cmpi ne, %6, %32 : vector<1x256xi32>
    %cst_13 = arith.constant 0.000000e+00 : f32
    %34 = vector.broadcast %cst_13 : f32 to vector<1x256xf32>
    %35 = arith.select %33, %31, %34 : vector<1x256xi1>, vector<1x256xf32>
    %36 = tpu.iota {dimensions = array<i32: 1>} : vector<1x256xi32>
    %c256_i32 = arith.constant 256 : i32
    %37 = arith.muli %arg1, %c256_i32 : i32
    %38 = vector.broadcast %37 : i32 to vector<1x256xi32>
    %39 = arith.addi %36, %38 : vector<1x256xi32>
    %c256_i32_14 = arith.constant 256 : i32
    %40 = vector.broadcast %c256_i32_14 : i32 to vector<1x256xi32>
    %41 = arith.cmpi slt, %39, %40 : vector<1x256xi32>
    %cst_15 = arith.constant 0.000000e+00 : f32
    %42 = vector.broadcast %cst_15 : f32 to vector<1x256xf32>
    %43 = arith.select %41, %35, %42 : vector<1x256xi1>, vector<1x256xf32>
    %c0_16 = arith.constant 0 : index
    %c0_17 = arith.constant 0 : index
    %c0_18 = arith.constant 0 : index
    %44 = vector.load %arg5[%c0_16, %c0_17, %c0_18] : memref<1x1x1xf32, #tpu.memory_space<vmem>>, vector<1x1x1xf32>
    %45 = vector.shape_cast %44 : vector<1x1x1xf32> to vector<1x1xf32>
    %46 = vector.shape_cast %43 : vector<1x256xf32> to vector<1x1x256xf32>
    %cst_19 = arith.constant dense<0.000000e+00> : vector<1xf32>
    %47 = vector.multi_reduction <add>, %46, %cst_19 [1, 2] : vector<1x1x256xf32> to vector<1xf32>
    %48 = vector.shape_cast %47 : vector<1xf32> to vector<1x1x1xf32>
    %49 = vector.extract %48[0, 0, 0] : f32 from vector<1x1x1xf32>
    %50 = vector.broadcast %49 : f32 to vector<1x1xf32>
    %51 = arith.addf %45, %50 : vector<1x1xf32>
    %c0_20 = arith.constant 0 : index
    %c0_21 = arith.constant 0 : index
    %c0_22 = arith.constant 0 : index
    %52 = vector.load %arg5[%c0_20, %c0_21, %c0_22] : memref<1x1x1xf32, #tpu.memory_space<vmem>>, vector<1x1x1xf32>
    %53 = vector.shape_cast %52 : vector<1x1x1xf32> to vector<1x1xf32>
    %54 = vector.shape_cast %51 : vector<1x1xf32> to vector<1x1x1xf32>
    tpu.vector_store %arg5[%c0_20, %c0_21, %c0_22], %54 {strides = array<i32>} : memref<1x1x1xf32, #tpu.memory_space<vmem>>, vector<1x1x1xf32>,
    return
  }
  func.func @transform_0(%arg0: i32, %arg1: i32) -> (i32, i32, i32) {
    %c0_i32 = arith.constant 0 : i32
    %c0_i32_0 = arith.constant 0 : i32
    return %arg0, %c0_i32, %arg1 : i32, i32, i32
  }
  func.func @transform_1(%arg0: i32, %arg1: i32) -> (i32, i32, i32) {
    %c0_i32 = arith.constant 0 : i32
    %c0_i32_0 = arith.constant 0 : i32
    return %arg0, %c0_i32, %arg1 : i32, i32, i32
  }
  func.func @transform_2(%arg0: i32, %arg1: i32) -> (i32, i32) {
    %c0_i32 = arith.constant 0 : i32
    %c0_i32_0 = arith.constant 0 : i32
    %c0_i32_1 = arith.constant 0 : i32
    return %c0_i32, %c0_i32_0 : i32, i32
  }
  func.func @transform_3(%arg0: i32, %arg1: i32) -> (i32, i32, i32) {
    %c0_i32 = arith.constant 0 : i32
    %c0_i32_0 = arith.constant 0 : i32
    %c0_i32_1 = arith.constant 0 : i32
    return %arg0, %c0_i32, %c0_i32_0 : i32, i32, i32
  }
}

</mosaic_0001>

<bundles_post_ra>
// kernel: tpu_custom_call.1
= control target key start
LH: loop header
LB: loop body
LE: loop exit
PB: predicated region body
PF: predicated region fallthrough
CT: control target
= control target key end

     0   :  { %8 = vsyncpa [#allocation3], 0  ;;  %s856_s0 = inlined_call_operand.hbm [shape: f32[2,4,256], index: 0, kind: input, shape index: {}]   ;;  %s857_s1 = inlined_call_operand.vmem [shape: s32[2,1,256], index: 1, kind: input, shape index: {}]   ;;  %s858_s2 = inlined_call_operand.vmem [shape: f32[4,1], index: 2, kind: input, shape index: {}]   ;;  %s859_s3 = inlined_call_operand.vmem [shape: f32[2,1,1], index: 3, kind: output, shape index: {}]  }
   0x1   :  { %10 = vsyncpa [#allocation3 + $0x1], 0  ;;  %s677_s12 = smov 0   ;;  %s679_s13 = smov 0  }
   0x2   :  { %s681_s14 = smov 0   ;;  %s683_s15 = smov 0  }
   0x3   :  { %s685_s16 = smov 0   ;;  %s687_s17 = smov 0  }
   0x4 LB: > { %s490_s18 = sadd.s32 4294967295, %s651_s17   ;;  %s28_s19 = sadd.s32 1, %s647_s16  ;;  %s651_s17 = sphi %s687_s17, %s16_s17   ;;  %s647_s16 = sphi %s685_s16, %s869_s16   ;;  %s643_s15 = sphi %s683_s15, %s868_s15   ;;  %s639_s14 = sphi %s681_s14, %s867_s14   ;;  %s635_s13 = sphi %s679_s13, %s866_s13   ;;  %s631_s12 = sphi %s677_s12, %s865_s12  }
   0x5   : > { %p30_p0 = scmp.ge.s32.totalorder %s28_s19, 2  ;;  %s37_s20 = sadd.s32 1, %s639_s14 }
   0x6   : > { %p44_p1 = scmp.ne.s32.totalorder %s639_s14, %s635_s13  ;;  %p45_p2 = scmp.eq.s32.totalorder %s651_s17, 0 }
   0x7   : > { %s871_s19 = smov (%p30_p0, %s28_s19), 0  ;;  %p50_p4 = scmp.ne.s32.totalorder %s635_s13, %s631_s12 }
   0x8   : > { %p713_p3 = por %p45_p2, %p44_p1  ;;  %s32_s22 = ssub.s32 %s647_s16, %s871_s19 }
   0x9   : > { %p51_p5 = scmp.eq.s32.totalorder %s490_s18, 0  ;;  %p35_p6 = scmp.eq.s32.totalorder %s32_s22, 0 }
   0xa   : > { %p511_p8 = scmp.lt.s32.totalorder %s651_s17, 2  ;;  %s152_s25 = sand.u32 1, %s639_s14  }
   0xb   : > { %p720_p7 = por %p51_p5, %p50_p4  ;;  %s502_s26 = sshll.u32 %s647_s16, 7 }
   0xc   : > { %s726_s24 = scalar_select %p35_p6, %s639_s14, %s37_s20  }
   0xd   : > { %s494_s27 = sshll.u32 %s152_s25, 3  ;;  %s733_s30 = scalar_lea.hbm %s856_s0, %s502_s26 }
   0xe   : > { %s156_s4 = scalar_lea.vmem [#allocation2], %s494_s27  ;;  %p737_p9 = pnand %p511_p8, %p713_p3 }
   0xf   : > { %s166_s5 = sshll.u32 %s156_s4, 4  ;;  %s153_s7 = scalar_lea.sflag [#allocation3], %s152_s25  ;;  %s741_s5 = int_to_ptr.vmem [resolvable:$true] %s166_s5 }
  0x10   : > { %s571_s8 = scalar_lea.hbm %s733_s30, 128  ;;  %p573_p13 = pneg %p737_p9 }
  0x11   : > { %p572_p12 = scmp.ne.s32.totalorder %s733_s30, %s571_s8  ;;  %s576_s11 = scalar_lea.hbm %s856_s0, 256 }
  0x12   : > { %p577_p2 = scmp.lt.u32.totalorder %s733_s30, %s856_s0  ;;  %p578_p3 = scmp.lt.u32.totalorder %s576_s11, %s571_s8 }
  0x13   : > { %p574_p0 = pnand %p573_p13, %p572_p12  ;;  %p580_p5 = scmp.lt.u32.totalorder %s571_s8, %s733_s30 }
  0x14   : > { %p579_p4 = por %p578_p3, %p577_p2 }
  0x15   : > { %p575_p1 = pneg %p574_p0 }
  0x16   : > { %p581_p6 = por %p580_p5, %p579_p4 }
  0x18   : > { %p582_p8 = pnand %p581_p6, %p575_p1 }
  0x1a   : > { %585 = shalt.err (!%p582_p8)
}
  0x1b   : > { %s586_s20 = scalar_lea.vmem %s741_s5, 128  ;;  %s653_s21 = smov [#allocation2]  }
  0x1c   : > { %p587_p12 = scmp.ne.s32.totalorder %s741_s5, %s586_s20  ;;  %s591_s22 = sshll.u32 %s653_s21, 4  ;;  %s592_s22 = int_to_ptr.vmem [resolvable:$false] %s591_s22 }
  0x1d   : > { %s593_s25 = scalar_lea.vmem %s592_s22, 256  ;;  %p594_p11 = scmp.lt.s32.totalorder %s741_s5, %s592_s22 }
  0x1e   : > { %p589_p0 = pnand %p587_p12, %p573_p13  ;;  %p595_p2 = scmp.lt.s32.totalorder %s593_s25, %s586_s20 }
  0x20   : > { %p590_p10 = pneg %p589_p0  ;;  %p596_p3 = por %p595_p2, %p594_p11 }
  0x22   : > { %p597_p4 = pnand %p596_p3, %p590_p10 }
  0x24   : > { %600 = shalt.err (!%p597_p4)
}
  0x25   : > { %510 = dma.hbm_to_vmem [thread:$0]  (!%p737_p9), %s733_s30, 128, %s741_s5, %s153_s7  }
  0x26   : > { %p863_p1 = scmp.lt.s32.totalorder %s651_s17, 3  ;;  %p864_p5 = scmp.ge.s32.totalorder %s651_s17, 1 }
  0x28   : > { %p184_p13 = pnand %p864_p5, %p863_p1 }
  0x29   : > { %s189_s26 = sand.u32 (!%p184_p13), 1, %s635_s13  }
  0x2a   : > { %187 = sbr.rel (%p184_p13) target bundleno = 416 (0x1a0), region = 32  ;;  %s498_s27 = sshll.u32 (!%p184_p13), %s189_s26, 3 }
  0x2b   : > { %s190_s28 = scalar_lea.sflag (!%p184_p13), [#allocation3], %s189_s26  ;;  %s193_s29 = scalar_lea.vmem (!%p184_p13), [#allocation2], %s498_s27 }
  0x31   : > { %626 = dma.done.wait (%p720_p7), %s190_s28, 128  }
  0x32   : > { %628 = vsyncadd (%p720_p7), %s190_s28, 4294967168  ;;  %v654_v0 = vmov 0   ;;  %v243_v1 = vld [vmem:[%s858_s2] sm:$0xf]  ;;  %vm247_vm0 = vcmask 1043456   ;;  %p224_p7 = scmp.lt.s32.totalorder %s643_s15, 1  ;;  %v292_v23 = vlaneseq }
  0x33   : > { %563 = vset.pattern.permute.xlu0 %v654_v0  ;;  %v241_v2 = vld [vmem:[%s193_s29] sm:$0xff]  ;;  %vm388_vm4 = vcmask 1040384   ;;  %vm239_vm5 = vcmask 0  }
  0x34   : > { %322 = vperm.xlu0 %563, %v243_v1   ;;  %v245_v3 = vcombine.high %v241_v2, %v241_v2  ;;  %v248_v4 = vsel %vm247_vm0, %v241_v2, -inf  ;;  %s873_s15 = smov (!%p224_p7, %s643_s15), 1  ;;  %v797_v26 = vshrl.u32 %v292_v23, 7 }
  0x35   : > { %v249_v6 = vrot.slane %v248_v4, 4  ;;  %s499_s23 = sshll.u32 %s873_s15, 1  ;;  %s234_s10 = scalar_lea.vmem %s859_s3, %s873_s15 }
  0x36   : > { %v255_v5 = vsel %vm247_vm0, %v245_v3, -inf  ;;  %s230_s7 = scalar_lea.vmem %s857_s1, %s499_s23  ;;  %v296_v29 = vsub.s32 0, %v797_v26  ;;  %v300_v30 = vsub.s32 1, %v797_v26 }
  0x37   : > { %v256_v7 = vrot.slane %v255_v5, 4  ;;  %v250_v8 = vmax.f32 %v248_v4, %v249_v6  ;;  %v804_v32 = vld [vmem:[%s230_s7] sm:$0x3] }
  0x38   : > { %v297_v35 = vrot.slane %v804_v32, %v296_v29  ;;  %v301_v36 = vrot.slane %v804_v32, %v300_v30  ;;  %vm345_vm3 = vcmp.ne.s32.totalorder %v804_v32, 255 }
  0x39   : > { %v257_v9 = vmax.f32 %v255_v5, %v256_v7  ;;  %v251_v10 = vrot.slane %v250_v8, 2 }
  0x3a   : > { %vm302_vm1 = vcmp.eq.s32.totalorder %v797_v26, %v297_v35  ;;  %vm303_vm2 = vcmp.eq.s32.totalorder %v797_v26, %v301_v36 }
  0x3b   : > { %v258_v11 = vrot.slane %v257_v9, 2  ;;  %v252_v12 = vmax.f32 %v250_v8, %v251_v10  ;;  %v304_v40 = vsel %vm302_vm1, %v241_v2, 0.0  ;;  %v305_v41 = vsel %vm303_vm2, %v245_v3, 0.0 }
  0x3c   : > { %v306_v44 = vsel %vm247_vm0, %v304_v40, 0.0  ;;  %v313_v45 = vsel %vm247_vm0, %v305_v41, 0.0  ;;  %v656_v40 = vmov 0.0  }
  0x3d   : > { %v259_v13 = vmax.f32 %v257_v9, %v258_v11  ;;  %v253_v14 = vrot.slane %v252_v12, 1  ;;  %v307_v48 = vrot.slane %v306_v44, 4  ;;  %v314_v49 = vrot.slane %v313_v45, 4  ;;  %240 = vst.msk [vmem:[%s234_s10] sm:$0x1] %vm239_vm5, %v656_v40 }
  0x3e   : > { %v655_v9 = vmov 1966171168  }
  0x3f   : > { %v260_v15 = vrot.slane %v259_v13, 1  ;;  %v784_v16 = vmax.f32 %v252_v12, %v253_v14  ;;  %v308_v50 = vadd.f32 %v307_v48, %v306_v44  ;;  %v315_v51 = vadd.f32 %v314_v49, %v313_v45 }
  0x40   : > { %v350_v10 = vunpack.c.l.s4 %v655_v9 }
  0x41   : > { %v786_v17 = vmax.f32 %v259_v13, %v260_v15  ;;  %v309_v52 = vrot.slane %v308_v50, 2  ;;  %v316_v53 = vrot.slane %v315_v51, 2 }
  0x43   : > { %v264_v18 = vcombine.low %v784_v16, %v786_v17  ;;  %v310_v54 = vadd.f32 %v309_v52, %v308_v50  ;;  %v317_v55 = vadd.f32 %v316_v53, %v315_v51 }
  0x45   : > { %v266_v19 = vsub.f32 %v241_v2, %v264_v18  ;;  %v311_v61 = vrot.slane %v310_v54, 1  ;;  %v318_v62 = vrot.slane %v317_v55, 1 }
  0x47   : > { %v267_v20 = vmul.f32 1.442695, %v266_v19  ;;  %v312_v7 = vadd.f32 %v311_v61, %v310_v54  ;;  %v319_v8 = vadd.f32 %v318_v62, %v317_v55  ;;  %v351_v19 = vunpack.c.0.s8 %v350_v10 }
  0x49   : > { %565 = vpow2.f32 %v267_v20 }
  0x53   : > { %v566_v21 = vpop.eup %565 }
  0x54   : > { %v270_v22 = vcombine.high %v566_v21, %v566_v21  ;;  %v272_v24 = vsel %vm247_vm0, %v566_v21, 0.0 }
  0x55   : > { %v273_v27 = vrot.slane %v272_v24, 4 }
  0x56   : > { %v279_v25 = vsel %vm247_vm0, %v270_v22, 0.0 }
  0x57   : > { %v280_v28 = vrot.slane %v279_v25, 4  ;;  %v274_v31 = vadd.f32 %v273_v27, %v272_v24 }
  0x59   : > { %v281_v33 = vadd.f32 %v280_v28, %v279_v25  ;;  %v275_v34 = vrot.slane %v274_v31, 2 }
  0x5b   : > { %v282_v37 = vrot.slane %v281_v33, 2  ;;  %v276_v38 = vadd.f32 %v275_v34, %v274_v31  ;;  %v354_v31 = vsub.s32 %v351_v19, %v797_v26  ;;  %v387_v26 = vld [vmem:[%s234_s10] sm:$0x1] }
  0x5d   : > { %v283_v39 = vadd.f32 %v282_v37, %v281_v33  ;;  %v277_v42 = vrot.slane %v276_v38, 1 }
  0x5f   : > { %v284_v43 = vrot.slane %v283_v39, 1  ;;  %v278_v46 = vadd.f32 %v277_v42, %v276_v38 }
  0x61   : > { %v285_v47 = vadd.f32 %v284_v43, %v283_v39  ;;  %567 = vlog2.f32 %v278_v46 }
  0x63   : > { %569 = vlog2.f32 %v285_v47 }
  0x6b   : > { %v568_v56 = vpop.eup %567 }
  0x6c   : > { %v287_v1 = vmul.f32 0.6931472, %v568_v56 }
  0x6d   : > { %v570_v57 = vpop.eup %569 }
  0x6e   : > { %v289_v2 = vmul.f32 0.6931472, %v570_v57  ;;  %v290_v11 = vadd.f32 %v287_v1, %v784_v16 }
  0x70   : > { %v291_v12 = vadd.f32 %v289_v2, %v786_v17  ;;  %v341_v22 = vsub.f32 %v290_v11, %v312_v7 }
  0x72   : > { %v342_v23 = vsub.f32 %v291_v12, %v319_v8 }
  0xb3   : > { %v323_v58 = vpop.permute.xlu0 %322 }
  0xb4   : > { %v325_v59 = vsel %vm302_vm1, %v323_v58, 0.0  ;;  %v326_v60 = vsel %vm303_vm2, %v323_v58, 0.0 }
  0xb5   : > { %v327_v63 = vsel %vm247_vm0, %v325_v59, 0.0  ;;  %v334_v0 = vsel %vm247_vm0, %v326_v60, 0.0 }
  0xb6   : > { %v328_v3 = vrot.slane %v327_v63, 4  ;;  %v335_v4 = vrot.slane %v334_v0, 4 }
  0xb8   : > { %v329_v5 = vadd.f32 %v328_v3, %v327_v63  ;;  %v336_v6 = vadd.f32 %v335_v4, %v334_v0 }
  0xba   : > { %v330_v13 = vrot.slane %v329_v5, 2  ;;  %v337_v14 = vrot.slane %v336_v6, 2 }
  0xbc   : > { %v331_v15 = vadd.f32 %v330_v13, %v329_v5  ;;  %v338_v18 = vadd.f32 %v337_v14, %v336_v6 }
  0xbe   : > { %v332_v20 = vrot.slane %v331_v15, 1  ;;  %v339_v21 = vrot.slane %v338_v18, 1 }
  0xc0   : > { %v333_v24 = vadd.f32 %v332_v20, %v331_v15  ;;  %v340_v25 = vadd.f32 %v339_v21, %v338_v18 }
  0xc2   : > { %v343_v27 = vmul.f32 %v341_v22, %v333_v24  ;;  %v344_v28 = vmul.f32 %v342_v23, %v340_v25 }
  0xc4   : > { %v348_v33 = vcombine.low %v343_v27, %v344_v28 }
  0xc6   : > { %v355_v16 = vrot.slane %v348_v33, %v354_v31 }
  0xc8   : > { %v362_v17 = vrot.slane %v355_v16, %v354_v31 }
  0xca   : > { %v364_v34 = vsel %vm345_vm3, %v362_v17, 0.0 }
  0xcb   : > { %v378_v35 = vrot.slane %v364_v34, %v296_v29  ;;  %v382_v36 = vrot.slane %v364_v34, %v300_v30 }
  0xcd   : > { %v389_v37 = vsel %vm388_vm4, %v378_v35, 0.0  ;;  %v390_v38 = vsel %vm388_vm4, %v382_v36, 0.0 }
  0xce   : > { %v391_v39 = vadd.f32 %v390_v38, %v389_v37 }
  0xd0   : > { %392 = vadd.xlane.f32.xlu0 %v391_v39 }
 0x15d   : > { %v393_v32 = vpop.xlane.xlu0 %392 }
 0x15e   : > { %v394_v41 = vrot.slane %v393_v32, 4 }
 0x160   : > { %v395_v42 = vadd.f32 %v394_v41, %v393_v32 }
 0x162   : > { %v396_v43 = vrot.slane %v395_v42, 2 }
 0x164   : > { %v397_v44 = vadd.f32 %v396_v43, %v395_v42 }
 0x166   : > { %v398_v29 = vrot.slane %v397_v44, 1 }
 0x168   : > { %v399_v45 = vadd.f32 %v398_v29, %v397_v44 }
 0x16a   : > { %503 = vpush %v399_v45 }
 0x19b   : > { %s504_s11 = spop %503 }
 0x19c   : > { %v401_v30 = vstv %s504_s11 }
 0x19d   : > { %v402_v46 = vadd.f32 %v401_v30, %v387_v26 }
 0x19f   : > { %404 = vst.msk [vmem:[%s234_s10] sm:$0x1] %vm239_vm5, %v402_v46 }
 0x1a0 PF: > { %s16_s17 = sadd.s32 1, %s651_s17   ;;  %s865_s12 = smov %s635_s13 }
 0x1a1   : > { %p13_p9 = scmp.ge.s32.totalorder %s16_s17, 4   ;;  %s866_s13 = smov %s639_s14 }
 0x1a2   : > { %s867_s14 = smov %s726_s24  ;;  %s868_s15 = smov %s647_s16 }
 0x1a3   : > { %s869_s16 = smov %s871_s19  ;;  %15 = sbr.rel (!%p13_p9) target bundleno = 4 (0x4), region = 79 }
 0x1aa   :  { %422 = vsyncpa [#allocation3], 1 }
 0x1ab   :  { %424 = vsyncpa [#allocation3 + $0x1], 1 }

</bundles_post_ra>
